<compile_context>
chip_gen: v7x
topology: tpu7x:2x2x1
jax: 0.10.0
libtpu: 0.0.40
codegen_flags: <defaults>
</compile_context>

<pallas_src>
import functools

import jax
import jax.numpy as jnp
import numpy as np
from jax import lax
from jax.experimental import pallas as pl
from jax.experimental.pallas import tpu as pltpu


# ---------------------------------------------------------------------------
# Pallas kernel: the full bottleneck for Nb batch elements, (C, H*W) layout.
# ---------------------------------------------------------------------------
def asymmetric_neck_kernel(H, W, Cin, Cout, Nb,
                           x_ref, w1_ref, wm21_ref, wm22_ref, w3_ref,
                           b1_ref, b2_ref, maskw_ref, maskh_ref, prelu_ref,
                           o_ref):
    HW = H * W
    Cd = w1_ref.shape[0]
    f32 = jnp.float32

    a1 = prelu_ref[0]
    a2 = prelu_ref[1]
    a3 = prelu_ref[2]

    # Grid-invariant operands, loaded once per step.
    w1 = w1_ref[...]                                   # (Cd, Cin)   mm dtype
    wm21 = wm21_ref[...]                               # (Cd, 5*Cd)  f32
    wm22 = wm22_ref[...]                               # (Cd, 5*Cd)  f32
    w3 = w3_ref[...]                                   # (Cout, Cd)  mm dtype
    b1 = b1_ref[...]                                   # (Cd, 1)     f32
    b2 = b2_ref[...]                                   # (Cout, 1)   f32
    masks_w = maskw_ref[...]                           # (4, HW) f32, taps -2,-1,+1,+2
    masks_h = maskh_ref[...]                           # (4, HW) f32

    def tap_stack(src, unit, masks):
        # Build the (5*Cd, HW) stacked operand: tap k (offset d = k-2) is
        # src shifted so row x holds src[x + d*unit], with out-of-image lanes
        # zeroed by the precomputed boundary mask.  Shifts are XLU rolls.
        parts = []
        for k in range(5):
            d = k - 2
            if d == 0:
                parts.append(src)
            else:
                sh = pltpu.roll(src, shift=(-d * unit) % HW, axis=1)
                mi = k if k < 2 else k - 1             # masks stored for d=-2,-1,+1,+2
                parts.append(sh * masks[mi:mi + 1, :])
        return jnp.concatenate(parts, axis=0)          # (5*Cd, HW) f32

    for b in range(Nb):                                # Nb is a static int
        x = x_ref[b]                                   # (Cin, HW), bf16 or f32

        # conv1 (1x1, BN1 scale folded) -> BN1 shift -> PReLU1            [MXU]
        t = jnp.dot(w1, x, preferred_element_type=f32) + b1
        t = jnp.where(t >= 0, t, a1 * t)               # (Cd, HW) f32

        # conv_layer21: (1,5), pad (0,2) — one stacked MXU matmul          [MXU]
        st = tap_stack(t, 1, masks_w)
        t = jnp.dot(wm21, st, preferred_element_type=f32)

        # conv_layer22: (5,1), pad (2,0), BN1 scale folded into weights    [MXU]
        st = tap_stack(t, W, masks_h)
        t = jnp.dot(wm22, st, preferred_element_type=f32)

        t = t + b1                                     # module reuses batchnorm (BN1)
        t = jnp.where(t >= 0, t, a2 * t)               # PReLU2

        # conv3 (1x1, BN2 scale folded) -> Dropout2d (eval: identity) -> BN2 shift
        y = jnp.dot(w3, t.astype(x.dtype),
                    preferred_element_type=f32) + b2   # (Cout, HW) f32

        # Residual add (zero-extended channels) -> PReLU3.  Re-read x here to
        # keep its live range short.
        res = x_ref[b].astype(f32)                     # (Cin, HW)
        if Cout > Cin:
            y_lo = y[:Cin, :] + res
            y_lo = jnp.where(y_lo >= 0, y_lo, a3 * y_lo)
            y_hi = y[Cin:, :]
            y_hi = jnp.where(y_hi >= 0, y_hi, a3 * y_hi)
            o_ref[b, :Cin, :] = y_lo.astype(o_ref.dtype)
            o_ref[b, Cin:, :] = y_hi.astype(o_ref.dtype)
        else:
            y = y + res
            y = jnp.where(y >= 0, y, a3 * y)
            o_ref[b] = y.astype(o_ref.dtype)


# ---------------------------------------------------------------------------
# Wrapper: NCHW in, NCHW out.  Only free reshapes + parameter folding outside.
# ---------------------------------------------------------------------------
def asymmetric_neck(x, params, block_batch=None):
    """AsymmetricNeck forward (eval mode).  x: (N, Cin, H, W), f32 or bf16."""
    (conv1_w, conv21_w, conv22_w, conv3_w,
     bn1_g, bn1_b, bn1_m, bn1_v,
     bn2_g, bn2_b, bn2_m, bn2_v, prelu_a) = params
    eps = 1e-5
    f32 = jnp.float32

    N, Cin, H, W = x.shape
    Cd = conv1_w.shape[0]
    Cout = conv3_w.shape[0]
    HW = H * W

    # Flatten spatial onto the lane axis: a pure reshape, no transpose / copy.
    x_flat = x.reshape(N, Cin, HW)
    mm_dtype = x_flat.dtype

    # --- Choose how many images each grid step processes (Nb). -------------
    # Amortize the ~0.35us per-step overhead (aim for ~1 MiB moved per step)
    # while keeping >=2 grid steps so both v7x TensorCores stay busy.
    if block_batch is None:
        itemsize = jnp.dtype(mm_dtype).itemsize
        step_bytes = (Cin + Cout) * HW * itemsize
        Nb = max(1, min(N, (1 << 20) // max(step_bytes, 1)))
        while Nb > 1 and N // Nb < 2:
            Nb -= 1
        while N % Nb != 0:
            Nb -= 1
    else:
        Nb = int(block_batch)
        assert N % Nb == 0, (N, Nb)
    grid = (N // Nb,)

    # --- Fold BN (eval) scales into the adjacent conv weights. -------------
    s1 = (bn1_g / jnp.sqrt(bn1_v + eps)).astype(f32)
    b1 = (bn1_b.astype(f32) - bn1_m.astype(f32) * s1).reshape(Cd, 1)
    s2 = (bn2_g / jnp.sqrt(bn2_v + eps)).astype(f32)
    b2 = (bn2_b.astype(f32) - bn2_m.astype(f32) * s2).reshape(Cout, 1)

    w1f = (conv1_w[:, :, 0, 0].astype(f32) * s1[:, None]).astype(mm_dtype)   # (Cd, Cin)
    w3f = (conv3_w[:, :, 0, 0].astype(f32) * s2[:, None]).astype(mm_dtype)   # (Cout, Cd)

    # Tap-conv weights as (Cd, 5*Cd) mix matrices for one MXU matmul per tap
    # conv: w_mix[co, k*Cd + ci] = torch_weight[co, ci, tap k]  (BN1 scale
    # folded into the (5,1) conv's output channels).
    wm21 = jnp.transpose(conv21_w[:, :, 0, :].astype(f32),
                         (0, 2, 1)).reshape(Cd, 5 * Cd)                      # (Cd, 5*Cd)
    wm22 = jnp.transpose(conv22_w[:, :, :, 0].astype(f32) * s1[:, None, None],
                         (0, 2, 1)).reshape(Cd, 5 * Cd)                      # (Cd, 5*Cd)

    # Grid-invariant boundary masks for taps d = -2,-1,+1,+2 (zero the lanes
    # whose tap falls outside the image); computed once, passed to the kernel.
    lane = jnp.arange(HW, dtype=jnp.int32)
    w_idx = lane % W
    h_idx = lane // W

    def make_masks(coord, cmax):
        return jnp.stack(
            [((coord + d >= 0) & (coord + d < cmax)).astype(f32)
             for d in (-2, -1, 1, 2)], axis=0)                               # (4, HW)

    masks_w = make_masks(w_idx, W)
    masks_h = make_masks(h_idx, H)

    def rep(arr):
        shape = arr.shape
        return pl.BlockSpec(shape, lambda n, _r=len(shape): (0,) * _r)

    kernel = functools.partial(asymmetric_neck_kernel, H, W, Cin, Cout, Nb)

    # TODO(synk): sweep vmem_limit_bytes per generation (64-96 MiB helps on
    #             v5e/v6e at realistic sizes); 32 MiB is ample for this demo
    #             and safe on v7x's 64 MiB VMEM.
    out_flat = pl.pallas_call(
        kernel,
        out_shape=jax.ShapeDtypeStruct((N, Cout, HW), x_flat.dtype),
        grid=grid,
        in_specs=[
            pl.BlockSpec((Nb, Cin, HW), lambda n: (n, 0, 0)),
            rep(w1f), rep(wm21), rep(wm22), rep(w3f),
            rep(b1), rep(b2),
            rep(masks_w), rep(masks_h),
            pl.BlockSpec(memory_space=pltpu.MemorySpace.SMEM),
        ],
        out_specs=pl.BlockSpec((Nb, Cout, HW), lambda n: (n, 0, 0)),
        compiler_params=pltpu.CompilerParams(
            dimension_semantics=("parallel",),
            vmem_limit_bytes=32 * 1024 * 1024),
    )(x_flat, w1f, wm21, wm22, w3f, b1, b2, masks_w, masks_h,
      prelu_a.astype(f32))

    return out_flat.reshape(N, Cout, H, W)


# ---------------------------------------------------------------------------
# Pure-JAX reference (eval-mode semantics) for verification.
# ---------------------------------------------------------------------------
def ref_forward(x, params):
    (conv1_w, conv21_w, conv22_w, conv3_w,
     bn1_g, bn1_b, bn1_m, bn1_v,
     bn2_g, bn2_b, bn2_m, bn2_v, prelu_a) = params
    eps = 1e-5
    x = x.astype(jnp.float32)
    Cin = x.shape[1]
    Cout = conv3_w.shape[0]

    def conv(v, w, pad):
        return lax.conv_general_dilated(
            v, w.astype(jnp.float32), (1, 1), pad,
            dimension_numbers=("NCHW", "OIHW", "NCHW"),
            precision=lax.Precision.HIGHEST)

    def bn(v, g, b, m, var):
        inv = (g / jnp.sqrt(var + eps))[None, :, None, None]
        return (v - m[None, :, None, None]) * inv + b[None, :, None, None]

    def prelu(v, a):
        return jnp.where(v >= 0, v, a * v)

    t = conv(x, conv1_w, ((0, 0), (0, 0)))
    t = prelu(bn(t, bn1_g, bn1_b, bn1_m, bn1_v), prelu_a[0])
    t = conv(t, conv21_w, ((0, 0), (2, 2)))              # (1,5) conv
    t = conv(t, conv22_w, ((2, 2), (0, 0)))              # (5,1) conv
    t = prelu(bn(t, bn1_g, bn1_b, bn1_m, bn1_v), prelu_a[1])
    t = conv(t, conv3_w, ((0, 0), (0, 0)))
    t = bn(t, bn2_g, bn2_b, bn2_m, bn2_v)                # dropout: identity (eval)
    main = x
    if Cout > Cin:
        main = jnp.pad(main, ((0, 0), (0, Cout - Cin), (0, 0), (0, 0)))
    return prelu(t + main, prelu_a[2])


# ---------------------------------------------------------------------------
if __name__ == "__main__":
    N, Cin, Cout, H, W = 2, 16, 32, 16, 16
    Cd = Cin // 4                                        # projection_ratio = 4

    key = jax.random.PRNGKey(0)
    ks = jax.random.split(key, 13)

    # PyTorch-layout (OIHW) conv weights, no biases.
    conv1_w = jax.random.normal(ks[0], (Cd, Cin, 1, 1), jnp.float32) * 0.2
    conv21_w = jax.random.normal(ks[1], (Cd, Cd, 1, 5), jnp.float32) * 0.2
    conv22_w = jax.random.normal(ks[2], (Cd, Cd, 5, 1), jnp.float32) * 0.2
    conv3_w = jax.random.normal(ks[3], (Cout, Cd, 1, 1), jnp.float32) * 0.2

    bn1_g = jax.random.uniform(ks[4], (Cd,), jnp.float32, 0.5, 1.5)
    bn1_b = jax.random.normal(ks[5], (Cd,), jnp.float32) * 0.1
    bn1_m = jax.random.normal(ks[6], (Cd,), jnp.float32) * 0.1
    bn1_v = jax.random.uniform(ks[7], (Cd,), jnp.float32, 0.5, 1.5)

    bn2_g = jax.random.uniform(ks[8], (Cout,), jnp.float32, 0.5, 1.5)
    bn2_b = jax.random.normal(ks[9], (Cout,), jnp.float32) * 0.1
    bn2_m = jax.random.normal(ks[10], (Cout,), jnp.float32) * 0.1
    bn2_v = jax.random.uniform(ks[11], (Cout,), jnp.float32, 0.5, 1.5)

    prelu_a = jnp.full((3,), 0.25, jnp.float32)          # nn.PReLU() default init

    params = (conv1_w, conv21_w, conv22_w, conv3_w,
              bn1_g, bn1_b, bn1_m, bn1_v,
              bn2_g, bn2_b, bn2_m, bn2_v, prelu_a)

    x = jax.random.normal(ks[12], (N, Cin, H, W), jnp.float32)   # NCHW like PyTorch

    # f32 path: tight check against the conv reference.
    out_f32 = jax.block_until_ready(asymmetric_neck(x, params))
    ref_f32 = jax.block_until_ready(ref_forward(x, params))
    assert out_f32.shape == (N, Cout, H, W), out_f32.shape
    assert np.allclose(np.asarray(out_f32), np.asarray(ref_f32),
                       rtol=5e-3, atol=5e-3), (
        float(np.max(np.abs(np.asarray(out_f32) - np.asarray(ref_f32)))))

    # bf16 activation path (halved HBM traffic); compare against the reference
    # evaluated on the same bf16-rounded input in f32.
    x_bf16 = x.astype(jnp.bfloat16)
    out_bf16 = jax.block_until_ready(asymmetric_neck(x_bf16, params))
    ref_bf16 = jax.block_until_ready(ref_forward(x_bf16, params))
    assert out_bf16.dtype == jnp.bfloat16
    out_bf16_f = np.asarray(jax.block_until_ready(out_bf16.astype(jnp.float32)))
    assert np.allclose(out_bf16_f, np.asarray(ref_bf16),
                       rtol=5e-2, atol=5e-2), (
        float(np.max(np.abs(out_bf16_f - np.asarray(ref_bf16)))))

    print("KERNEL_OK")
</pallas_src>

<mosaic_0001>
module attributes {stable_mosaic.version = 11 : i64} {
  func.func @asymmetric_neck_kernel(%arg0: i32, %arg1: memref<1x16x256xf32, #tpu.memory_space<vmem>>, %arg2: memref<4x16xf32, #tpu.memory_space<vmem>>, %arg3: memref<4x20xf32, #tpu.memory_space<vmem>>, %arg4: memref<4x20xf32, #tpu.memory_space<vmem>>, %arg5: memref<32x4xf32, #tpu.memory_space<vmem>>, %arg6: memref<4x1xf32, #tpu.memory_space<vmem>>, %arg7: memref<32x1xf32, #tpu.memory_space<vmem>>, %arg8: memref<4x256xf32, #tpu.memory_space<vmem>>, %arg9: memref<4x256xf32, #tpu.memory_space<vmem>>, %arg10: memref<3xf32, #tpu.memory_space<smem>>, %arg11: memref<1x32x256xf32, #tpu.memory_space<vmem>>) attributes {dimension_semantics = [#tpu.dimension_semantics<parallel>], iteration_bounds = array<i64: 2>, scalar_prefetch = 0 : i64, scratch_operands = 0 : i64, tpu.core_type = #tpu.core_type<tc>, window_params = [{transform_indices = @transform_0, window_bounds = array<i64: 1, 16, 256>}, {pipeline_mode = #tpu.pipeline_mode<synchronous>, transform_indices = @transform_1, window_bounds = array<i64: 4, 16>}, {pipeline_mode = #tpu.pipeline_mode<synchronous>, transform_indices = @transform_2, window_bounds = array<i64: 4, 20>}, {pipeline_mode = #tpu.pipeline_mode<synchronous>, transform_indices = @transform_3, window_bounds = array<i64: 4, 20>}, {pipeline_mode = #tpu.pipeline_mode<synchronous>, transform_indices = @transform_4, window_bounds = array<i64: 32, 4>}, {pipeline_mode = #tpu.pipeline_mode<synchronous>, transform_indices = @transform_5, window_bounds = array<i64: 4, 1>}, {pipeline_mode = #tpu.pipeline_mode<synchronous>, transform_indices = @transform_6, window_bounds = array<i64: 32, 1>}, {pipeline_mode = #tpu.pipeline_mode<synchronous>, transform_indices = @transform_7, window_bounds = array<i64: 4, 256>}, {pipeline_mode = #tpu.pipeline_mode<synchronous>, transform_indices = @transform_8, window_bounds = array<i64: 4, 256>}, {transform_indices = @transform_9, window_bounds = array<i64: 3>}, {transform_indices = @transform_10, window_bounds = array<i64: 1, 32, 256>}]} {
    %c0 = arith.constant 0 : index
    %0 = memref.load %arg10[%c0] : memref<3xf32, #tpu.memory_space<smem>>
    %c1 = arith.constant 1 : index
    %1 = memref.load %arg10[%c1] : memref<3xf32, #tpu.memory_space<smem>>
    %c2 = arith.constant 2 : index
    %2 = memref.load %arg10[%c2] : memref<3xf32, #tpu.memory_space<smem>>
    %c0_0 = arith.constant 0 : index
    %c0_1 = arith.constant 0 : index
    %3 = vector.load %arg2[%c0_0, %c0_1] : memref<4x16xf32, #tpu.memory_space<vmem>>, vector<4x16xf32>
    %c0_2 = arith.constant 0 : index
    %c0_3 = arith.constant 0 : index
    %4 = vector.load %arg3[%c0_2, %c0_3] : memref<4x20xf32, #tpu.memory_space<vmem>>, vector<4x20xf32>
    %c0_4 = arith.constant 0 : index
    %c0_5 = arith.constant 0 : index
    %5 = vector.load %arg4[%c0_4, %c0_5] : memref<4x20xf32, #tpu.memory_space<vmem>>, vector<4x20xf32>
    %c0_6 = arith.constant 0 : index
    %c0_7 = arith.constant 0 : index
    %6 = vector.load %arg5[%c0_6, %c0_7] : memref<32x4xf32, #tpu.memory_space<vmem>>, vector<32x4xf32>
    %c0_8 = arith.constant 0 : index
    %c0_9 = arith.constant 0 : index
    %7 = vector.load %arg6[%c0_8, %c0_9] : memref<4x1xf32, #tpu.memory_space<vmem>>, vector<4x1xf32>
    %c0_10 = arith.constant 0 : index
    %c0_11 = arith.constant 0 : index
    %8 = vector.load %arg7[%c0_10, %c0_11] : memref<32x1xf32, #tpu.memory_space<vmem>>, vector<32x1xf32>
    %c0_12 = arith.constant 0 : index
    %c0_13 = arith.constant 0 : index
    %9 = vector.load %arg8[%c0_12, %c0_13] : memref<4x256xf32, #tpu.memory_space<vmem>>, vector<4x256xf32>
    %c0_14 = arith.constant 0 : index
    %c0_15 = arith.constant 0 : index
    %10 = vector.load %arg9[%c0_14, %c0_15] : memref<4x256xf32, #tpu.memory_space<vmem>>, vector<4x256xf32>
    %c0_16 = arith.constant 0 : index
    %c0_17 = arith.constant 0 : index
    %c0_18 = arith.constant 0 : index
    %11 = vector.load %arg1[%c0_16, %c0_17, %c0_18] : memref<1x16x256xf32, #tpu.memory_space<vmem>>, vector<1x16x256xf32>
    %12 = vector.shape_cast %11 : vector<1x16x256xf32> to vector<16x256xf32>
    %cst = arith.constant dense<0.000000e+00> : vector<4x256xf32>
    %13 = tpu.matmul %3, %12, %cst {dimension_numbers = #tpu.dot_dimension_numbers<[1], [0], [0], [1], [0, 0, 1, 1], [], []>} : vector<4x16xf32>, vector<16x256xf32>, vector<4x256xf32> -> vector<4x256xf32>
    %14 = vector.broadcast %7 : vector<4x1xf32> to vector<4x256xf32>
    %15 = arith.addf %13, %14 : vector<4x256xf32>
    %cst_19 = arith.constant 0.000000e+00 : f32
    %16 = vector.broadcast %cst_19 : f32 to vector<4x256xf32>
    %17 = arith.cmpf oge, %15, %16 : vector<4x256xf32>
    %18 = vector.broadcast %0 : f32 to vector<4x256xf32>
    %19 = arith.mulf %18, %15 : vector<4x256xf32>
    %20 = arith.select %17, %15, %19 : vector<4x256xi1>, vector<4x256xf32>
    %c2_i32 = arith.constant 2 : i32
    %21 = tpu.dynamic_rotate %20 by %c2_i32 dim 1 : vector<4x256xf32>, i32 -> vector<4x256xf32>
    %22 = vector.extract_strided_slice %9 {offsets = [0, 0], sizes = [1, 256], strides = [1, 1]} : vector<4x256xf32> to vector<1x256xf32>
    %23 = vector.broadcast %22 : vector<1x256xf32> to vector<4x256xf32>
    %24 = arith.mulf %21, %23 : vector<4x256xf32>
    %c1_i32 = arith.constant 1 : i32
    %25 = tpu.dynamic_rotate %20 by %c1_i32 dim 1 : vector<4x256xf32>, i32 -> vector<4x256xf32>
    %26 = vector.extract_strided_slice %9 {offsets = [1, 0], sizes = [1, 256], strides = [1, 1]} : vector<4x256xf32> to vector<1x256xf32>
    %27 = vector.broadcast %26 : vector<1x256xf32> to vector<4x256xf32>
    %28 = arith.mulf %25, %27 : vector<4x256xf32>
    %c255_i32 = arith.constant 255 : i32
    %29 = tpu.dynamic_rotate %20 by %c255_i32 dim 1 : vector<4x256xf32>, i32 -> vector<4x256xf32>
    %30 = vector.extract_strided_slice %9 {offsets = [2, 0], sizes = [1, 256], strides = [1, 1]} : vector<4x256xf32> to vector<1x256xf32>
    %31 = vector.broadcast %30 : vector<1x256xf32> to vector<4x256xf32>
    %32 = arith.mulf %29, %31 : vector<4x256xf32>
    %c254_i32 = arith.constant 254 : i32
    %33 = tpu.dynamic_rotate %20 by %c254_i32 dim 1 : vector<4x256xf32>, i32 -> vector<4x256xf32>
    %34 = vector.extract_strided_slice %9 {offsets = [3, 0], sizes = [1, 256], strides = [1, 1]} : vector<4x256xf32> to vector<1x256xf32>
    %35 = vector.broadcast %34 : vector<1x256xf32> to vector<4x256xf32>
    %36 = arith.mulf %33, %35 : vector<4x256xf32>
    %37 = tpu.concatenate %24, %28, %20, %32, %36 in 0 : vector<4x256xf32>, vector<4x256xf32>, vector<4x256xf32>, vector<4x256xf32>, vector<4x256xf32> -> vector<20x256xf32>
    %cst_20 = arith.constant dense<0.000000e+00> : vector<4x256xf32>
    %38 = tpu.matmul %4, %37, %cst_20 {dimension_numbers = #tpu.dot_dimension_numbers<[1], [0], [0], [1], [0, 0, 1, 1], [], []>} : vector<4x20xf32>, vector<20x256xf32>, vector<4x256xf32> -> vector<4x256xf32>
    %c32_i32 = arith.constant 32 : i32
    %39 = tpu.dynamic_rotate %38 by %c32_i32 dim 1 : vector<4x256xf32>, i32 -> vector<4x256xf32>
    %40 = vector.extract_strided_slice %10 {offsets = [0, 0], sizes = [1, 256], strides = [1, 1]} : vector<4x256xf32> to vector<1x256xf32>
    %41 = vector.broadcast %40 : vector<1x256xf32> to vector<4x256xf32>
    %42 = arith.mulf %39, %41 : vector<4x256xf32>
    %c16_i32 = arith.constant 16 : i32
    %43 = tpu.dynamic_rotate %38 by %c16_i32 dim 1 : vector<4x256xf32>, i32 -> vector<4x256xf32>
    %44 = vector.extract_strided_slice %10 {offsets = [1, 0], sizes = [1, 256], strides = [1, 1]} : vector<4x256xf32> to vector<1x256xf32>
    %45 = vector.broadcast %44 : vector<1x256xf32> to vector<4x256xf32>
    %46 = arith.mulf %43, %45 : vector<4x256xf32>
    %c240_i32 = arith.constant 240 : i32
    %47 = tpu.dynamic_rotate %38 by %c240_i32 dim 1 : vector<4x256xf32>, i32 -> vector<4x256xf32>
    %48 = vector.extract_strided_slice %10 {offsets = [2, 0], sizes = [1, 256], strides = [1, 1]} : vector<4x256xf32> to vector<1x256xf32>
    %49 = vector.broadcast %48 : vector<1x256xf32> to vector<4x256xf32>
    %50 = arith.mulf %47, %49 : vector<4x256xf32>
    %c224_i32 = arith.constant 224 : i32
    %51 = tpu.dynamic_rotate %38 by %c224_i32 dim 1 : vector<4x256xf32>, i32 -> vector<4x256xf32>
    %52 = vector.extract_strided_slice %10 {offsets = [3, 0], sizes = [1, 256], strides = [1, 1]} : vector<4x256xf32> to vector<1x256xf32>
    %53 = vector.broadcast %52 : vector<1x256xf32> to vector<4x256xf32>
    %54 = arith.mulf %51, %53 : vector<4x256xf32>
    %55 = tpu.concatenate %42, %46, %38, %50, %54 in 0 : vector<4x256xf32>, vector<4x256xf32>, vector<4x256xf32>, vector<4x256xf32>, vector<4x256xf32> -> vector<20x256xf32>
    %cst_21 = arith.constant dense<0.000000e+00> : vector<4x256xf32>
    %56 = tpu.matmul %5, %55, %cst_21 {dimension_numbers = #tpu.dot_dimension_numbers<[1], [0], [0], [1], [0, 0, 1, 1], [], []>} : vector<4x20xf32>, vector<20x256xf32>, vector<4x256xf32> -> vector<4x256xf32>
    %57 = vector.broadcast %7 : vector<4x1xf32> to vector<4x256xf32>
    %58 = arith.addf %56, %57 : vector<4x256xf32>
    %cst_22 = arith.constant 0.000000e+00 : f32
    %59 = vector.broadcast %cst_22 : f32 to vector<4x256xf32>
    %60 = arith.cmpf oge, %58, %59 : vector<4x256xf32>
    %61 = vector.broadcast %1 : f32 to vector<4x256xf32>
    %62 = arith.mulf %61, %58 : vector<4x256xf32>
    %63 = arith.select %60, %58, %62 : vector<4x256xi1>, vector<4x256xf32>
    %cst_23 = arith.constant dense<0.000000e+00> : vector<32x256xf32>
    %64 = tpu.matmul %6, %63, %cst_23 {dimension_numbers = #tpu.dot_dimension_numbers<[1], [0], [0], [1], [0, 0, 1, 1], [], []>} : vector<32x4xf32>, vector<4x256xf32>, vector<32x256xf32> -> vector<32x256xf32>
    %65 = vector.broadcast %8 : vector<32x1xf32> to vector<32x256xf32>
    %66 = arith.addf %64, %65 : vector<32x256xf32>
    %c0_24 = arith.constant 0 : index
    %c0_25 = arith.constant 0 : index
    %c0_26 = arith.constant 0 : index
    %67 = vector.load %arg1[%c0_24, %c0_25, %c0_26] : memref<1x16x256xf32, #tpu.memory_space<vmem>>, vector<1x16x256xf32>
    %68 = vector.shape_cast %67 : vector<1x16x256xf32> to vector<16x256xf32>
    %69 = vector.extract_strided_slice %66 {offsets = [0, 0], sizes = [16, 256], strides = [1, 1]} : vector<32x256xf32> to vector<16x256xf32>
    %70 = arith.addf %69, %68 : vector<16x256xf32>
    %cst_27 = arith.constant 0.000000e+00 : f32
    %71 = vector.broadcast %cst_27 : f32 to vector<16x256xf32>
    %72 = arith.cmpf oge, %70, %71 : vector<16x256xf32>
    %73 = vector.broadcast %2 : f32 to vector<16x256xf32>
    %74 = arith.mulf %73, %70 : vector<16x256xf32>
    %75 = arith.select %72, %70, %74 : vector<16x256xi1>, vector<16x256xf32>
    %76 = vector.extract_strided_slice %66 {offsets = [16, 0], sizes = [16, 256], strides = [1, 1]} : vector<32x256xf32> to vector<16x256xf32>
    %cst_28 = arith.constant 0.000000e+00 : f32
    %77 = vector.broadcast %cst_28 : f32 to vector<16x256xf32>
    %78 = arith.cmpf oge, %76, %77 : vector<16x256xf32>
    %79 = vector.broadcast %2 : f32 to vector<16x256xf32>
    %80 = arith.mulf %79, %76 : vector<16x256xf32>
    %81 = arith.select %78, %76, %80 : vector<16x256xi1>, vector<16x256xf32>
    %c0_29 = arith.constant 0 : index
    %c0_30 = arith.constant 0 : index
    %c0_31 = arith.constant 0 : index
    %82 = vector.load %arg11[%c0_29, %c0_30, %c0_31] : memref<1x32x256xf32, #tpu.memory_space<vmem>>, vector<1x16x256xf32>
    %83 = vector.shape_cast %82 : vector<1x16x256xf32> to vector<16x256xf32>
    %84 = vector.shape_cast %75 : vector<16x256xf32> to vector<1x16x256xf32>
    tpu.vector_store %arg11[%c0_29, %c0_30, %c0_31], %84 {strides = array<i32>} : memref<1x32x256xf32, #tpu.memory_space<vmem>>, vector<1x16x256xf32>,
    %c0_32 = arith.constant 0 : index
    %c16 = arith.constant 16 : index
    %c0_33 = arith.constant 0 : index
    %85 = vector.load %arg11[%c0_32, %c16, %c0_33] : memref<1x32x256xf32, #tpu.memory_space<vmem>>, vector<1x16x256xf32>
    %86 = vector.shape_cast %85 : vector<1x16x256xf32> to vector<16x256xf32>
    %87 = vector.shape_cast %81 : vector<16x256xf32> to vector<1x16x256xf32>
    tpu.vector_store %arg11[%c0_32, %c16, %c0_33], %87 {strides = array<i32>} : memref<1x32x256xf32, #tpu.memory_space<vmem>>, vector<1x16x256xf32>,
    return
  }
  func.func @transform_0(%arg0: i32) -> (i32, i32, i32) {
    %c0_i32 = arith.constant 0 : i32
    %c0_i32_0 = arith.constant 0 : i32
    %c0_i32_1 = arith.constant 0 : i32
    return %arg0, %c0_i32, %c0_i32_0 : i32, i32, i32
  }
  func.func @transform_1(%arg0: i32) -> (i32, i32) {
    %c0_i32 = arith.constant 0 : i32
    %c0_i32_0 = arith.constant 0 : i32
    %c0_i32_1 = arith.constant 0 : i32
    return %c0_i32, %c0_i32_0 : i32, i32
  }
  func.func @transform_2(%arg0: i32) -> (i32, i32) {
    %c0_i32 = arith.constant 0 : i32
    %c0_i32_0 = arith.constant 0 : i32
    %c0_i32_1 = arith.constant 0 : i32
    return %c0_i32, %c0_i32_0 : i32, i32
  }
  func.func @transform_3(%arg0: i32) -> (i32, i32) {
    %c0_i32 = arith.constant 0 : i32
    %c0_i32_0 = arith.constant 0 : i32
    %c0_i32_1 = arith.constant 0 : i32
    return %c0_i32, %c0_i32_0 : i32, i32
  }
  func.func @transform_4(%arg0: i32) -> (i32, i32) {
    %c0_i32 = arith.constant 0 : i32
    %c0_i32_0 = arith.constant 0 : i32
    %c0_i32_1 = arith.constant 0 : i32
    return %c0_i32, %c0_i32_0 : i32, i32
  }
  func.func @transform_5(%arg0: i32) -> (i32, i32) {
    %c0_i32 = arith.constant 0 : i32
    %c0_i32_0 = arith.constant 0 : i32
    %c0_i32_1 = arith.constant 0 : i32
    return %c0_i32, %c0_i32_0 : i32, i32
  }
  func.func @transform_6(%arg0: i32) -> (i32, i32) {
    %c0_i32 = arith.constant 0 : i32
    %c0_i32_0 = arith.constant 0 : i32
    %c0_i32_1 = arith.constant 0 : i32
    return %c0_i32, %c0_i32_0 : i32, i32
  }
  func.func @transform_7(%arg0: i32) -> (i32, i32) {
    %c0_i32 = arith.constant 0 : i32
    %c0_i32_0 = arith.constant 0 : i32
    %c0_i32_1 = arith.constant 0 : i32
    return %c0_i32, %c0_i32_0 : i32, i32
  }
  func.func @transform_8(%arg0: i32) -> (i32, i32) {
    %c0_i32 = arith.constant 0 : i32
    %c0_i32_0 = arith.constant 0 : i32
    %c0_i32_1 = arith.constant 0 : i32
    return %c0_i32, %c0_i32_0 : i32, i32
  }
  func.func @transform_9(%arg0: i32) -> i32 {
    %c0_i32 = arith.constant 0 : i32
    %c0_i32_0 = arith.constant 0 : i32
    return %c0_i32 : i32
  }
  func.func @transform_10(%arg0: i32) -> (i32, i32, i32) {
    %c0_i32 = arith.constant 0 : i32
    %c0_i32_0 = arith.constant 0 : i32
    %c0_i32_1 = arith.constant 0 : i32
    return %arg0, %c0_i32, %c0_i32_0 : i32, i32, i32
  }
}

</mosaic_0001>

<bundles_post_ra>
// kernel: tpu_custom_call.1
= control target key start
LH: loop header
LB: loop body
LE: loop exit
PB: predicated region body
PF: predicated region fallthrough
CT: control target
= control target key end

     0   :  { %s1946_s0 = inlined_call_operand.vmem [shape: f32[2,16,256], index: 0, kind: input, shape index: {}]   ;;  %s1947_s1 = inlined_call_operand.hbm [shape: f32[4,16], index: 1, kind: input, shape index: {}]   ;;  %s1948_s2 = inlined_call_operand.hbm [shape: f32[4,20], index: 2, kind: input, shape index: {}]   ;;  %s1949_s3 = inlined_call_operand.vmem [shape: f32[4,20], index: 3, kind: input, shape index: {}]   ;;  %s1950_s4 = inlined_call_operand.vmem [shape: f32[32,4], index: 4, kind: input, shape index: {}]   ;;  %s1951_s5 = inlined_call_operand.vmem [shape: f32[4,1], index: 5, kind: input, shape index: {}]   ;;  %s1952_s6 = inlined_call_operand.vmem [shape: f32[32,1], index: 6, kind: input, shape index: {}]   ;;  %s1953_s7 = inlined_call_operand.vmem [shape: f32[4,256], index: 7, kind: input, shape index: {}]   ;;  %s1954_s8 = inlined_call_operand.vmem [shape: f32[4,256], index: 8, kind: input, shape index: {}]   ;;  %s1955_s9 = inlined_call_operand.vmem [shape: f32[3], index: 9, kind: input, shape index: {}]   ;;  %s1956_s10 = inlined_call_operand.hbm [shape: f32[2,32,256], index: 10, kind: output, shape index: {}]  }
   0x1   :  { %1963 = sst [smem:[#allocation17_spill]] %s1955_s9 }
   0x2   :  { %15 = vsyncpa [#allocation3], 0 }
   0x3   :  { %16 = vsyncpa [#allocation7], 0 }
   0x4   :  { %17 = vsyncpa [#allocation5], 0 }
   0x5   :  { %18 = vsyncpa [#allocation4], 0 }
   0x6   :  { %20 = vsyncpa [#allocation4 + $0x1], 0  ;;  %s1549_s13 = smov 0   ;;  %s1551_s14 = smov 0  }
   0x7   :  { %s1553_s15 = smov 0   ;;  %s1555_s16 = smov 0  }
   0x8 LB: > { %1964 = sst [smem:[#allocation14_spill]] %s1473_s15  ;;  %s1570_s17 = sadd.s32 4294967295, %s1477_s16   ;;  %s1477_s16 = sphi %s1555_s16, %s1982_s16   ;;  %s1473_s15 = sphi %s1553_s15, %s1984_s15   ;;  %s1469_s14 = sphi %s1551_s14, %s1986_s14   ;;  %s1465_s13 = sphi %s1549_s13, %s1985_s13  }
   0x9   : > { %s1202_s18 = sadd.s32 4294967294, %s1477_s16   ;;  %s1574_s19 = sadd.s32 1, %s1477_s16  }
   0xa   : > { %1965 = sst [smem:[#allocation15_spill]] %s1574_s19  ;;  %s248_s20 = sadd.s32 1, %s1473_s15 }
   0xb   : > { %s245_s21 = ssub.s32 %s1477_s16, %s1574_s19  ;;  %p258_p0 = scmp.ne.s32.totalorder %s1473_s15, %s1469_s14 }
   0xc   : > { %p246_p1 = scmp.eq.s32.totalorder %s245_s21, 0  ;;  %p259_p2 = scmp.eq.s32.totalorder %s1570_s17, 1 }
   0xd   : > { %p264_p3 = scmp.ne.s32.totalorder %s1469_s14, %s1465_s13  ;;  %p265_p4 = scmp.eq.s32.totalorder %s1202_s18, 1 }
   0xe   : > { %s1585_s22 = scalar_select %p246_p1, %s1473_s15, %s248_s20  }
   0xf   : > { %p1587_p5 = por %p259_p2, %p258_p0  ;;  %p1591_p6 = por %p265_p4, %p264_p3 }
  0x10   : > { %1966 = sst [smem:[#allocation16_spill]] %s1585_s22  ;;  %p1203_p7 = scmp.ge.s32.totalorder %s1477_s16, 1 }
  0x11   : > { %s1967_s23 = scalar_select %p1587_p5, 1, 0 }
  0x12   : > { %s1968_s24 = scalar_select %p1591_p6, 1, 0 }
  0x13   : > { %p272_p8 = scmp.lt.s32.totalorder %s1477_s16, 3  ;;  %p1957_p9 = scmp.eq.s32.totalorder %s1570_s17, 0 }
  0x14   : > { %s1479_s26 = smov [#allocation2]   ;;  %s1480_s28 = smov [#allocation6]  }
  0x15   : > { %p1598_p10 = pnand %p1203_p7, %p272_p8  ;;  %s285_s27 = sshll.u32 %s1479_s26, 4  ;;  %s286_s27 = int_to_ptr.vmem [resolvable:$true] %s285_s27 }
  0x16   : > { %s296_s29 = sshll.u32 %s1480_s28, 4  ;;  %s1970_s9 = sld [smem:[#allocation17_spill]]  ;;  %s1613_s29 = int_to_ptr.vmem [resolvable:$true] %s296_s29 }
  0x17   : > { %s1969_s25 = scalar_select %p1598_p10, 1, 0 }
  0x18   : > { %p1263_p11 = pneg %p1598_p10  ;;  %s1332_s26 = scalar_lea.hbm %s1947_s1, 64 }
  0x19   : > { %p1333_p13 = scmp.ne.s32.totalorder %s1947_s1, %s1332_s26  ;;  %p1339_p3 = scmp.lt.u32.totalorder %s1332_s26, %s1947_s1 }
  0x1a   : > { %p1609_p12 = pnand %p1957_p9, %p1263_p11 }
  0x1c   : > { %s325_s12 = sshll.u32 %s1970_s9, 4  ;;  %p1625_p0 = pneg %p1609_p12  ;;  %s1615_s12 = int_to_ptr.vmem [resolvable:$true] %s325_s12 }
  0x1e   : > { %p1335_p1 = pnand %p1625_p0, %p1333_p13 }
  0x20   : > { %p1336_p2 = pneg %p1335_p1 }
  0x22   : > { %p1341_p4 = pnand %p1339_p3, %p1336_p2 }
  0x24   : > { %1344 = shalt.err (!%p1341_p4)
}
  0x25   : > { %s1345_s20 = scalar_lea.vmem %s286_s27, 64  ;;  %p1353_p9 = scmp.lt.s32.totalorder %s286_s27, %s286_s27 }
  0x26   : > { %p1346_p7 = scmp.ne.s32.totalorder %s286_s27, %s1345_s20  ;;  %p1354_p6 = scmp.lt.s32.totalorder %s1345_s20, %s1345_s20 }
  0x28   : > { %p1348_p8 = pnand %p1346_p7, %p1625_p0  ;;  %p1355_p5 = por %p1354_p6, %p1353_p9 }
  0x2a   : > { %p1349_p11 = pneg %p1348_p8 }
  0x2c   : > { %p1356_p10 = pnand %p1355_p5, %p1349_p11 }
  0x2e   : > { %1359 = shalt.err (!%p1356_p10)
}
  0x2f   : > { %1266 = dma.hbm_to_vmem [thread:$0]  (!%p1609_p12), %s1947_s1, 64, %s286_s27, [#allocation3]  }
  0x30   : > { %s1360_s28 = scalar_lea.hbm %s1948_s2, 64 }
  0x31   : > { %p1361_p13 = scmp.ne.s32.totalorder %s1948_s2, %s1360_s28  ;;  %p1367_p5 = scmp.lt.u32.totalorder %s1360_s28, %s1948_s2 }
  0x33   : > { %p1363_p1 = pnand %p1361_p13, %p1625_p0 }
  0x35   : > { %p1364_p6 = pneg %p1363_p1 }
  0x37   : > { %p1369_p9 = pnand %p1367_p5, %p1364_p6 }
  0x39   : > { %1372 = shalt.err (!%p1369_p9)
}
  0x3a   : > { %s1373_s27 = scalar_lea.vmem %s1613_s29, 64  ;;  %p1381_p4 = scmp.lt.s32.totalorder %s1613_s29, %s1613_s29 }
  0x3b   : > { %p1374_p10 = scmp.ne.s32.totalorder %s1613_s29, %s1373_s27  ;;  %p1382_p7 = scmp.lt.s32.totalorder %s1373_s27, %s1373_s27 }
  0x3d   : > { %p1376_p2 = pnand %p1374_p10, %p1625_p0  ;;  %p1383_p8 = por %p1382_p7, %p1381_p4 }
  0x3f   : > { %p1377_p3 = pneg %p1376_p2 }
  0x41   : > { %p1384_p11 = pnand %p1383_p8, %p1377_p3 }
  0x43   : > { %1387 = shalt.err (!%p1384_p11)
}
  0x44   : > { %1269 = dma.hbm_to_vmem [thread:$0]  (!%p1609_p12), %s1948_s2, 64, %s1613_s29, [#allocation7]  }
  0x45   : > { %s1388_s22 = scalar_lea.vmem %s1615_s12, 16  ;;  %p1396_p5 = scmp.lt.s32.totalorder %s1615_s12, %s1615_s12 }
  0x46   : > { %p1389_p13 = scmp.ne.s32.totalorder %s1615_s12, %s1388_s22  ;;  %p1397_p9 = scmp.lt.s32.totalorder %s1388_s22, %s1388_s22 }
  0x48   : > { %p1391_p1 = pnand %p1389_p13, %p1625_p0  ;;  %p1398_p10 = por %p1397_p9, %p1396_p5 }
  0x4a   : > { %p1392_p6 = pneg %p1391_p1 }
  0x4c   : > { %p1399_p2 = pnand %p1398_p10, %p1392_p6 }
  0x4e   : > { %1402 = shalt.err (!%p1399_p2)
}
  0x4f   : > { %s1481_s21 = smov [#allocation8]   ;;  %p1973_p3 = scmp.ne.s32.totalorder %s1969_s25, 0 }
  0x50   : > { %1272 = dma.vmem_to_smem (!%p1609_p12), %s1615_s12, 16, %s1481_s21, [#allocation5]  }
  0x51   : > { %346 = sbr.rel (%p1973_p3) target bundleno = 1276 (0x4fc), region = 60  ;;  %p1974_p4 = scmp.eq.s32.totalorder (!%p1973_p3), %s1570_s17, 0 }
  0x58   : > { %1448 = dma.done.wait (%p1974_p4), [#allocation3], 64   ;;  %p1975_p0 = pmov %p1974_p4 }
  0x5a   : > { %1450 = vsyncadd (%p1975_p0), [#allocation3], 4294967232  ;;  %p1976_p7 = pmov %p1975_p0 }
  0x5b   : > { %p1977_p8 = pmov %p1975_p0 }
  0x5c   : > { %1452 = dma.done.wait (%p1976_p7), [#allocation7], 64  }
  0x5d   : > { %1454 = vsyncadd (%p1977_p8), [#allocation7], 4294967232  ;;  %p1978_p11 = pmov %p1975_p0 }
  0x5e   : > { %p1979_p12 = pmov %p1975_p0 }
  0x5f   : > { %1456 = dma.done.wait (%p1978_p11), [#allocation5], 16  }
  0x60   : > { %1458 = vsyncadd (%p1979_p12), [#allocation5], 4294967280 }
  0x61   : > { %360 = sfence }
  0x62   : > { %p393_p13 = scmp.lt.s32.totalorder %s1570_s17, 1  ;;  %v1482_v0 = vmov 0.0   ;;  %v1483_v1 = vmov 0   ;;  %v408_v2 = vld [vmem:[%s1951_s5] sm:$0xf]  ;;  %vm424_vm0 = vcmask 130048   ;;  %v510_v20 = vlaneseq }
  0x63   : > { %492 = vmatprep.mubr.f32.mxu0 %v1482_v0  ;;  %1330 = vset.pattern.permute.xlu0 %v1483_v1  ;;  %v401_v9 = vld [vmem:[#allocation2] sm:$0xf]  ;;  %s398_s28 = sld [smem:[#allocation8]]  ;;  %s1484_s11 = smov 127   ;;  %vm629_vm6 = vcmask 1043456   ;;  %vm634_vm8 = vcmask 162816  }
  0x64   : > { %s394_s12 = scalar_select %p393_p13, %s1570_s17, 1  ;;  %421 = vperm.xlu0 %1330, %v408_v2   ;;  %1030 = vmatprep.mubr.f32.mxu1 %v1482_v0  ;;  %v1726_v21 = vshrl.u32 %v510_v20, 7  ;;  %v413_v23 = vld [vmem:[%s1953_s7] sm:$0xff]  ;;  %v1743_v29 = vand.u32 127, %v510_v20  ;;  %vm947_vm15 = vcmask 31744  }
  0x65   : > { %1331 = vset.pattern.permute.xlu1 %v1483_v1  ;;  %s1485_s20 = smov 1   ;;  %s1486_s27 = smov 2  }
  0x66   : > { %s1235_s18 = sshll.u32 %s394_s12, 5  ;;  %s1487_s15 = smov 126   ;;  %v1729_v22 = vsub.s32 1, %v1726_v21  ;;  %v549_v24 = vsub.s32 5, %v1726_v21  ;;  %v1736_v25 = vsub.s32 2, %v1726_v21  ;;  %v576_v26 = vsub.s32 6, %v1726_v21 }
  0x67   : > { %s397_s26 = scalar_lea.vmem %s1946_s0, %s1235_s18  ;;  %v1740_v27 = vsub.s32 0, %v1726_v21  ;;  %v522_v28 = vsub.s32 4, %v1726_v21  ;;  %v603_v38 = vsub.s32 7, %v1726_v21  ;;  %vm540_vm3 = vcmp.lt.s32.totalorder %v1743_v29, 1  ;;  %s1488_s21 = smov 16  }
  0x68   : > { %v1697_v3 = vld [vmem:[%s397_s26 + $0x8] sm:$0xff]  ;;  %v1699_v4 = vld [vmem:[%s397_s26 + $0x18] sm:$0xff]  ;;  %v1701_v5 = vld [vmem:[%s397_s26] sm:$0xff]  ;;  %v546_v30 = vrot.slane %v413_v23, %v1729_v22  ;;  %v550_v31 = vrot.slane %v413_v23, %v549_v24  ;;  %v573_v32 = vrot.slane %v413_v23, %v1736_v25  ;;  %v577_v33 = vrot.slane %v413_v23, %v576_v26  ;;  %s1489_s25 = smov 112   ;;  %s1490_s29 = smov 32  }
  0x69   : > { %v1237_v6 = vpack.c.bf16 %v1699_v4, %v1697_v3  ;;  %v1705_v7 = vld [vmem:[%s397_s26 + $0x10] sm:$0xff]  ;;  %v501_v12 = vstv %s398_s28  ;;  %v519_v36 = vrot.slane %v413_v23, %v1740_v27  ;;  %v523_v37 = vrot.slane %v413_v23, %v522_v28  ;;  %s1491_s12 = smov 96   ;;  %p1980_p6 = scmp.ne.s32.totalorder %s1967_s23, 0 }
  0x6a   : > { %v1239_v8 = vpack.c.bf16 %v1705_v7, %v1701_v5  ;;  %v556_v39 = vrot.slane %v546_v30, %v1729_v22  ;;  %v560_v40 = vrot.slane %v550_v31, %v1729_v22  ;;  %vm567_vm4 = vcmp.lt.s32.totalorder %v1743_v29, 127  ;;  %s1492_s26 = smov [#allocation9]  }
  0x6b   : > { %1238 = vmatprep.subr.bf16.mxu0 %v1237_v6  ;;  %v583_v41 = vrot.slane %v573_v32, %v1736_v25  ;;  %v587_v42 = vrot.slane %v577_v33, %v1736_v25  ;;  %vm512_vm5 = vcmp.lt.s32.totalorder %v1743_v29, 2  ;;  %v529_v45 = vrot.slane %v519_v36, %v1740_v27  ;;  %v402_v33 = vld [vmem:[#allocation6] sm:$0xf]  ;;  %v412_v36 = vld [vmem:[%s1952_s6 + $0x18] sm:$0xff]  ;;  %s1407_s28 = sshll.u32 %s1492_s26, 4  ;;  %s1408_s28 = int_to_ptr.vmem [resolvable:$false] %s1407_s28 }
  0x6c   : > { %1240 = vmatpush1.bf16.msra.mxu0 %v1239_v8  ;;  %v533_v46 = vrot.slane %v523_v37, %v1740_v27  ;;  %v1765_v47 = vsub.s32 3, %v1726_v21  ;;  %v604_v48 = vrot.slane %v413_v23, %v603_v38  ;;  %vm594_vm7 = vcmp.lt.s32.totalorder %v1743_v29, 126  ;;  %v414_v37 = vld [vmem:[%s1954_s8] sm:$0xff] }
  0x6d   : > { %vm747_vm9 = vcmp.lt.s32.totalorder %v1743_v29, 16  ;;  %vm774_vm10 = vcmp.lt.s32.totalorder %v1743_v29, 112  ;;  %vm719_vm11 = vcmp.lt.s32.totalorder %v1743_v29, 32  ;;  %vm801_vm12 = vcmp.lt.s32.totalorder %v1743_v29, 96  ;;  %v411_v29 = vld [vmem:[%s1952_s6 + $0x10] sm:$0xff] }
  0x6e   : > { %v600_v61 = vrot.slane %v413_v23, %v1765_v47  ;;  %v614_v1 = vrot.slane %v604_v48, %v1765_v47  ;;  %v730_v48 = vrot.slane %v414_v37, %v522_v28 }
  0x6f   : > { %1217 = vmatmul.mubr.msk.f32.vlgmr.msra.gmra.mrb[0].mxu0 %vm424_vm0, %v401_v9 }
  0x70   : > { %708 = vmatprep.mubr.f32.mxu0 %v1482_v0  ;;  %v610_v30 = vrot.slane %v600_v61, %v1765_v47  ;;  %v740_v28 = vrot.slane %v730_v48, %v1740_v27 }
  0xe3   : > { %v1710_v10 = vpop.permute.xlu0 %421 }
 0x142   : > { %v494_v11 = vpop.f32.mrb[0].mxu0 }
 0x143   : > { %v495_v13 = vadd.f32 %v494_v11, %v1710_v10  ;;  %v496_v14 = vpop.f32.mrb[1].mxu0 }
 0x144   : > { %v497_v15 = vadd.f32 %v496_v14, %v1710_v10 }
 0x145   : > { %vm499_vm1 = vcmp.ge.f32.partialorder %v495_v13, 0.0  ;;  %v502_v16 = vmul.f32 %v501_v12, %v495_v13 }
 0x146   : > { %v503_v18 = vmul.f32 %v501_v12, %v497_v15  ;;  %vm500_vm2 = vcmp.ge.f32.partialorder %v497_v15, 0.0 }
 0x147   : > { %v1714_v17 = vsel %vm499_vm1, %v495_v13, %v502_v16 }
 0x148   : > { %563 = vrot.lane.b32.xlu1 %v1714_v17, %s1484_s11  ;;  %536 = vrot.lane.b32.xlu0 %v1714_v17, %s1485_s20  ;;  %v1718_v19 = vsel %vm500_vm2, %v497_v15, %v503_v18 }
 0x14c   : > { %538 = vrot.lane.b32.xlu1 %v1718_v19, %s1485_s20  ;;  %565 = vrot.lane.b32.xlu0 %v1718_v19, %s1484_s11  ;;  %s1409_s11 = scalar_lea.vmem %s1408_s28, 2048 }
 0x150   : > { %506 = vrot.lane.b32.xlu1 %v1714_v17, %s1486_s27  ;;  %508 = vrot.lane.b32.xlu0 %v1718_v19, %s1486_s27  ;;  %s1216_s27 = sld [smem:[#allocation8 + $0x2]] }
 0x154   : > { %590 = vrot.lane.b32.xlu1 %v1714_v17, %s1487_s15  ;;  %592 = vrot.lane.b32.xlu0 %v1718_v19, %s1487_s15  ;;  %s390_s15 = sand.u32 1, %s1469_s14  }
 0x155   : > { %s1212_s19 = sshll.u32 %s390_s15, 6 }
 0x156   : > { %s1882_s22 = scalar_lea.vmem [#allocation9], %s1212_s19 }
 0x1ba   : > { %v564_v34 = vpop.permute.xlu1 %563  ;;  %v537_v35 = vpop.permute.xlu0 %536 }
 0x1be   : > { %v539_v43 = vpop.permute.xlu1 %538  ;;  %v566_v44 = vpop.permute.xlu0 %565 }
 0x1bf   : > { %v541_v49 = vsel %vm540_vm3, %v537_v35, %v539_v43  ;;  %v542_v50 = vsel %vm540_vm3, %v539_v43, %v537_v35  ;;  %v568_v51 = vsel %vm567_vm4, %v564_v34, %v566_v44  ;;  %v569_v52 = vsel %vm567_vm4, %v566_v44, %v564_v34  ;;  %v410_v35 = vld [vmem:[%s1952_s6 + $0x8] sm:$0xff] }
 0x1c0   : > { %v561_v53 = vmul.f32 %v556_v39, %v542_v50  ;;  %v562_v54 = vmul.f32 %v560_v40, %v541_v49  ;;  %v588_v55 = vmul.f32 %v583_v41, %v568_v51  ;;  %v589_v56 = vmul.f32 %v587_v42, %v569_v52 }
 0x1c1   : > { %v753_v39 = vrot.slane %v414_v37, %v1729_v22  ;;  %v757_v40 = vrot.slane %v414_v37, %v549_v24  ;;  %v780_v41 = vrot.slane %v414_v37, %v1736_v25  ;;  %v784_v42 = vrot.slane %v414_v37, %v576_v26 }
 0x1c2   : > { %v625_v57 = vrot.slane %v588_v55, 4  ;;  %v626_v58 = vrot.slane %v589_v56, 4  ;;  %v507_v59 = vpop.permute.xlu1 %506  ;;  %v509_v60 = vpop.permute.xlu0 %508  ;;  %v619_v2 = vrot.slane %v561_v53, 4  ;;  %v620_v6 = vrot.slane %v562_v54, 4 }
 0x1c3   : > { %v513_v62 = vsel %vm512_vm5, %v507_v59, %v509_v60  ;;  %v514_v63 = vsel %vm512_vm5, %v509_v60, %v507_v59  ;;  %v767_v49 = vrot.slane %v757_v40, %v1729_v22  ;;  %v790_v24 = vrot.slane %v780_v41, %v1736_v25 }
 0x1c4   : > { %v534_v8 = vmul.f32 %v529_v45, %v514_v63  ;;  %v535_v9 = vmul.f32 %v533_v46, %v513_v62  ;;  %v632_v11 = vsel %vm629_vm6, %v1714_v17, %v625_v57  ;;  %v633_v16 = vsel %vm629_vm6, %v1718_v19, %v626_v58 }
 0x1c5   : > { %v726_v45 = vrot.slane %v414_v37, %v1740_v27  ;;  %v763_v46 = vrot.slane %v753_v39, %v1729_v22  ;;  %v794_v50 = vrot.slane %v784_v42, %v1736_v25  ;;  %v811_v22 = vrot.slane %v414_v37, %v603_v38  ;;  %v404_v42 = vld [vmem:[%s1950_s4] sm:$0xff] }
 0x1c6   : > { %v630_v12 = vsel %vm629_vm6, %v534_v8, %v619_v2  ;;  %v591_v13 = vpop.permute.xlu1 %590  ;;  %v593_v14 = vpop.permute.xlu0 %592  ;;  %v631_v15 = vsel %vm629_vm6, %v535_v9, %v620_v6 }
 0x1c7   : > { %v596_v18 = vsel %vm594_vm7, %v593_v14, %v591_v13  ;;  %v1241_v20 = vpack.c.bf16 %v633_v16, %v631_v15  ;;  %v1243_v23 = vpack.c.bf16 %v632_v11, %v630_v12  ;;  %v595_v17 = vsel %vm594_vm7, %v591_v13, %v593_v14 }
 0x1c8   : > { %v616_v31 = vmul.f32 %v614_v1, %v596_v18  ;;  %v615_v32 = vmul.f32 %v610_v30, %v595_v17  ;;  %v736_v54 = vrot.slane %v726_v45, %v1740_v27  ;;  %v807_v1 = vrot.slane %v414_v37, %v1765_v47  ;;  %v407_v45 = vld [vmem:[%s1950_s4 + $0x18] sm:$0xff] }
 0x1c9   : > { %1242 = vmatprep.subr.bf16.mxu0 %v1241_v20  ;;  %v821_v21 = vrot.slane %v811_v22, %v1765_v47 }
 0x1ca   : > { %1244 = vmatpush1.bf16.msra.mxu0 %v1243_v23  ;;  %v817_v30 = vrot.slane %v807_v1, %v1765_v47  ;;  %v409_v47 = vld [vmem:[%s1952_s6] sm:$0xff] }
 0x1cb   : > { %1218 = vmatprep.subr.msk.mxu0 %vm629_vm6, %v616_v31 }
 0x1ce   : > { %1219 = vmatpush1.msk.msra.mxu0 %vm629_vm6, %v615_v32 }
 0x1cf   : > { %1220 = vmatmul.mubr.msk.f32.vlgmr.msra.gmra.mrb[2].mxu0 %vm634_vm8, %v402_v33  ;;  %v403_v33 = vld [vmem:[%s1949_s3] sm:$0xf] }
 0x1d0   : > { %913 = vmatprep.mubr.f32.mxu0 %v1482_v0 }
 0x2a2   : > { %v710_v19 = vpop.f32.mrb[2].mxu0 }
 0x2a3   : > { %743 = vrot.lane.b32.xlu1 %v710_v19, %s1488_s21  ;;  %v1792_v34 = vpop.f32.mrb[3].mxu0 }
 0x2a4   : > { %745 = vrot.lane.b32.xlu0 %v1792_v34, %s1488_s21 }
 0x2a7   : > { %770 = vrot.lane.b32.xlu1 %v710_v19, %s1489_s25 }
 0x2a8   : > { %772 = vrot.lane.b32.xlu0 %v1792_v34, %s1489_s25  ;;  %s1236_s25 = sshll.u32 %s1570_s17, 10  ;;  %s1904_s17 = scalar_lea.sflag [#allocation4], %s390_s15 }
 0x2a9   : > { %s1896_s30 = scalar_lea.hbm %s1956_s10, %s1236_s25 }
 0x2ab   : > { %715 = vrot.lane.b32.xlu1 %v710_v19, %s1490_s29 }
 0x2ac   : > { %717 = vrot.lane.b32.xlu0 %v1792_v34, %s1490_s29  ;;  %s1215_s29 = sld [smem:[#allocation8 + $0x1]] }
 0x2af   : > { %797 = vrot.lane.b32.xlu1 %v710_v19, %s1491_s12 }
 0x2b0   : > { %799 = vrot.lane.b32.xlu0 %v1792_v34, %s1491_s12 }
 0x2b3   : > { %929 = vperm.xlu1 %1331, %v409_v47  }
 0x2b4   : > { %934 = vperm.xlu0 %1330, %v410_v35  }
 0x2b7   : > { %939 = vperm.xlu1 %1331, %v411_v29  }
 0x2b8   : > { %944 = vperm.xlu0 %1330, %v412_v36  }
 0x315   : > { %v744_v43 = vpop.permute.xlu1 %743 }
 0x316   : > { %v746_v44 = vpop.permute.xlu0 %745 }
 0x317   : > { %v748_v26 = vsel %vm747_vm9, %v744_v43, %v746_v44  ;;  %v749_v51 = vsel %vm747_vm9, %v746_v44, %v744_v43  ;;  %v406_v44 = vld [vmem:[%s1950_s4 + $0x10] sm:$0xff] }
 0x318   : > { %v768_v57 = vmul.f32 %v763_v46, %v749_v51  ;;  %v769_v58 = vmul.f32 %v767_v49, %v748_v26 }
 0x319   : > { %v771_v52 = vpop.permute.xlu1 %770 }
 0x31a   : > { %v773_v53 = vpop.permute.xlu0 %772  ;;  %v826_v27 = vrot.slane %v768_v57, 4  ;;  %v827_v38 = vrot.slane %v769_v58, 4 }
 0x31b   : > { %v775_v55 = vsel %vm774_vm10, %v771_v52, %v773_v53  ;;  %v776_v56 = vsel %vm774_vm10, %v773_v53, %v771_v52 }
 0x31c   : > { %v795_v59 = vmul.f32 %v790_v24, %v775_v55  ;;  %v796_v60 = vmul.f32 %v794_v50, %v776_v56  ;;  %v1063_v50 = vstv %s1216_s27 }
 0x31d   : > { %v716_v25 = vpop.permute.xlu1 %715 }
 0x31e   : > { %v832_v61 = vrot.slane %v795_v59, 4  ;;  %v833_v62 = vrot.slane %v796_v60, 4  ;;  %v718_v63 = vpop.permute.xlu0 %717 }
 0x31f   : > { %v720_v2 = vsel %vm719_vm11, %v716_v25, %v718_v63  ;;  %v721_v6 = vsel %vm719_vm11, %v718_v63, %v716_v25 }
 0x320   : > { %v741_v8 = vmul.f32 %v736_v54, %v721_v6  ;;  %v742_v9 = vmul.f32 %v740_v28, %v720_v2  ;;  %v838_v12 = vsel %vm629_vm6, %v710_v19, %v832_v61  ;;  %v839_v16 = vsel %vm629_vm6, %v1792_v34, %v833_v62 }
 0x321   : > { %v798_v11 = vpop.permute.xlu1 %797  ;;  %v922_v34 = vstv %s1215_s29  ;;  %s1106_s29 = sshll.u32 %s1882_s22, 4  ;;  %s1898_s29 = int_to_ptr.vmem [resolvable:$true] %s1106_s29 }
 0x322   : > { %v836_v13 = vsel %vm629_vm6, %v741_v8, %v826_v27  ;;  %v800_v14 = vpop.permute.xlu0 %799  ;;  %v837_v15 = vsel %vm629_vm6, %v742_v9, %v827_v38  ;;  %s1403_s9 = scalar_lea.vmem %s1898_s29, 1024  ;;  %p1410_p10 = scmp.lt.s32.totalorder %s1898_s29, %s1408_s28 }
 0x323   : > { %v803_v18 = vsel %vm801_vm12, %v800_v14, %v798_v11  ;;  %v1245_v20 = vpack.c.bf16 %v839_v16, %v837_v15  ;;  %v1247_v23 = vpack.c.bf16 %v838_v12, %v836_v13  ;;  %v802_v17 = vsel %vm801_vm12, %v798_v11, %v800_v14  ;;  %p1404_p1 = scmp.ne.s32.totalorder %s1898_s29, %s1403_s9  ;;  %p1411_p2 = scmp.lt.s32.totalorder %s1409_s11, %s1403_s9 }
 0x324   : > { %v823_v31 = vmul.f32 %v821_v21, %v803_v18  ;;  %v822_v32 = vmul.f32 %v817_v30, %v802_v17 }
 0x325   : > { %1246 = vmatprep.subr.bf16.mxu0 %v1245_v20  ;;  %p1405_p5 = pnand %p1404_p1, %p1980_p6  ;;  %p1412_p3 = por %p1411_p2, %p1410_p10 }
 0x326   : > { %1248 = vmatpush1.bf16.msra.mxu0 %v1247_v23 }
 0x327   : > { %1221 = vmatprep.subr.msk.mxu0 %vm629_vm6, %v823_v31  ;;  %p1406_p9 = pneg %p1405_p5 }
 0x329   : > { %p1413_p4 = pnand %p1412_p3, %p1406_p9 }
 0x32a   : > { %1222 = vmatpush1.msk.msra.mxu0 %vm629_vm6, %v822_v32 }
 0x32b   : > { %1223 = vmatmul.mubr.msk.f32.vlgmr.msra.gmra.mrb[4].mxu0 %vm634_vm8, %v403_v33 }
 0x332   : > { %v930_v46 = vpop.permute.xlu1 %929 }
 0x333   : > { %v935_v52 = vpop.permute.xlu0 %934 }
 0x336   : > { %v940_v57 = vpop.permute.xlu1 %939 }
 0x337   : > { %v945_v6 = vpop.permute.xlu0 %944 }
 0x3fe   : > { %v915_v19 = vpop.f32.mrb[4].mxu0 }
 0x3ff   : > { %v916_v35 = vadd.f32 %v915_v19, %v1710_v10  ;;  %v917_v36 = vpop.f32.mrb[5].mxu0 }
 0x400   : > { %v918_v37 = vadd.f32 %v917_v36, %v1710_v10  ;;  %v405_v10 = vld [vmem:[%s1950_s4 + $0x8] sm:$0xff] }
 0x401   : > { %v923_v39 = vmul.f32 %v922_v34, %v916_v35  ;;  %vm920_vm14 = vcmp.ge.f32.partialorder %v916_v35, 0.0 }
 0x402   : > { %vm921_vm13 = vcmp.ge.f32.partialorder %v918_v37, 0.0  ;;  %v924_v40 = vmul.f32 %v922_v34, %v918_v37 }
 0x403   : > { %v925_v43 = vsel %vm920_vm14, %v916_v35, %v923_v39 }
 0x404   : > { %v926_v41 = vsel %vm921_vm13, %v918_v37, %v924_v40 }
 0x405   : > { %1224 = vmatprep.subr.msk.mxu1 %vm629_vm6, %v926_v41 }
 0x406   : > { %1225 = vmatpush1.msk.msra.mxu1 %vm629_vm6, %v925_v43 }
 0x407   : > { %1226 = vmatmul.mubr.msk.f32.vlgmr.msra.gmra.mrb[0].mxu1 %vm947_vm15, %v404_v42 }
 0x408   : > { %1036 = vmatprep.mubr.f32.mxu1 %v1482_v0 }
 0x40b   : > { %1227 = vmatmul.mubr.msk.f32.gmra.mrb[2].mxu1 %vm947_vm15, %v405_v10 }
 0x40c   : > { %1042 = vmatprep.mubr.f32.mxu1 %v1482_v0 }
 0x40f   : > { %1228 = vmatmul.mubr.msk.f32.gmra.mrb[4].mxu1 %vm947_vm15, %v406_v44 }
 0x410   : > { %1048 = vmatprep.mubr.f32.mxu1 %v1482_v0 }
 0x413   : > { %1229 = vmatmul.mubr.msk.f32.gmra.mrb[6].mxu1 %vm947_vm15, %v407_v45 }
 0x4da   : > { %v1032_v48 = vpop.f32.mrb[0].mxu1 }
 0x4db   : > { %v1033_v49 = vadd.f32 %v1032_v48, %v930_v46  ;;  %v1034_v24 = vpop.f32.mrb[1].mxu1 }
 0x4dc   : > { %v1035_v26 = vadd.f32 %v1034_v24, %v930_v46 }
 0x4dd   : > { %v1055_v51 = vadd.f32 %v1033_v49, %v1701_v5 }
 0x4de   : > { %v1056_v0 = vadd.f32 %v1035_v26, %v1697_v3  ;;  %v1038_v53 = vpop.f32.mrb[2].mxu1 }
 0x4df   : > { %vm1059_vm0 = vcmp.ge.f32.partialorder %v1055_v51, 0.0  ;;  %v1064_v54 = vmul.f32 %v1063_v50, %v1055_v51  ;;  %v1039_v55 = vadd.f32 %v1038_v53, %v935_v52  ;;  %v1040_v56 = vpop.f32.mrb[3].mxu1 }
 0x4e0   : > { %vm1060_vm1 = vcmp.ge.f32.partialorder %v1056_v0, 0.0  ;;  %v1065_v28 = vmul.f32 %v1063_v50, %v1056_v0  ;;  %v1041_v22 = vadd.f32 %v1040_v56, %v935_v52 }
 0x4e1   : > { %v1068_v58 = vsel %vm1059_vm0, %v1055_v51, %v1064_v54  ;;  %v1057_v59 = vadd.f32 %v1039_v55, %v1705_v7 }
 0x4e2   : > { %1084 = vst [vmem:[%s1882_s22] sm:$0xff] %v1068_v58  ;;  %v1069_v5 = vsel %vm1060_vm1, %v1056_v0, %v1065_v28  ;;  %v1058_v3 = vadd.f32 %v1041_v22, %v1699_v4  ;;  %v1044_v60 = vpop.f32.mrb[4].mxu1 }
 0x4e3   : > { %1085 = vst [vmem:[%s1882_s22 + $0x8] sm:$0xff] %v1069_v5  ;;  %vm1061_vm2 = vcmp.ge.f32.partialorder %v1057_v59, 0.0  ;;  %v1066_v25 = vmul.f32 %v1063_v50, %v1057_v59  ;;  %v1045_v61 = vadd.f32 %v1044_v60, %v940_v57  ;;  %v1046_v62 = vpop.f32.mrb[5].mxu1 }
 0x4e4   : > { %vm1062_vm3 = vcmp.ge.f32.partialorder %v1058_v3, 0.0  ;;  %v1067_v63 = vmul.f32 %v1063_v50, %v1058_v3  ;;  %v1047_v7 = vadd.f32 %v1046_v62, %v940_v57 }
 0x4e5   : > { %v1070_v1 = vsel %vm1061_vm2, %v1057_v59, %v1066_v25  ;;  %vm1072_vm4 = vcmp.ge.f32.partialorder %v1045_v61, 0.0  ;;  %v1076_v2 = vmul.f32 %v1063_v50, %v1045_v61 }
 0x4e6   : > { %1086 = vst [vmem:[%s1882_s22 + $0x10] sm:$0xff] %v1070_v1  ;;  %v1071_v4 = vsel %vm1062_vm3, %v1058_v3, %v1067_v63  ;;  %vm1073_vm5 = vcmp.ge.f32.partialorder %v1047_v7, 0.0  ;;  %v1077_v21 = vmul.f32 %v1063_v50, %v1047_v7  ;;  %v1050_v27 = vpop.f32.mrb[6].mxu1 }
 0x4e7   : > { %1087 = vst [vmem:[%s1882_s22 + $0x18] sm:$0xff] %v1071_v4  ;;  %v1080_v38 = vsel %vm1072_vm4, %v1045_v61, %v1076_v2  ;;  %v1051_v8 = vadd.f32 %v1050_v27, %v945_v6  ;;  %v1052_v9 = vpop.f32.mrb[7].mxu1 }
 0x4e8   : > { %1088 = vst [vmem:[%s1882_s22 + $0x20] sm:$0xff] %v1080_v38  ;;  %v1081_v11 = vsel %vm1073_vm5, %v1047_v7, %v1077_v21  ;;  %v1053_v12 = vadd.f32 %v1052_v9, %v945_v6 }
 0x4e9   : > { %1089 = vst [vmem:[%s1882_s22 + $0x28] sm:$0xff] %v1081_v11  ;;  %vm1074_vm6 = vcmp.ge.f32.partialorder %v1051_v8, 0.0  ;;  %v1078_v13 = vmul.f32 %v1063_v50, %v1051_v8 }
 0x4ea   : > { %vm1075_vm7 = vcmp.ge.f32.partialorder %v1053_v12, 0.0  ;;  %v1079_v14 = vmul.f32 %v1063_v50, %v1053_v12 }
 0x4eb   : > { %v1082_v15 = vsel %vm1074_vm6, %v1051_v8, %v1078_v13 }
 0x4ec   : > { %1090 = vst [vmem:[%s1882_s22 + $0x30] sm:$0xff] %v1082_v15  ;;  %v1083_v16 = vsel %vm1075_vm7, %v1053_v12, %v1079_v14 }
 0x4ed   : > { %1091 = vst [vmem:[%s1882_s22 + $0x38] sm:$0xff] %v1083_v16 }
 0x4ee   : > { %1416 = shalt.err (!%p1413_p4)
}
 0x4ef   : > { %s1417_s20 = scalar_lea.hbm %s1896_s30, 1024  ;;  %s1421_s19 = scalar_lea.hbm %s1956_s10, 2048 }
 0x4f0   : > { %p1418_p0 = scmp.ne.s32.totalorder %s1896_s30, %s1417_s20  ;;  %p1422_p11 = scmp.lt.u32.totalorder %s1896_s30, %s1956_s10 }
 0x4f1   : > { %p1423_p12 = scmp.lt.u32.totalorder %s1421_s19, %s1417_s20  ;;  %p1425_p1 = scmp.lt.u32.totalorder %s1417_s20, %s1896_s30 }
 0x4f2   : > { %p1419_p7 = pnand %p1418_p0, %p1980_p6 }
 0x4f3   : > { %p1424_p13 = por %p1423_p12, %p1422_p11 }
 0x4f4   : > { %p1420_p8 = pneg %p1419_p7 }
 0x4f5   : > { %p1426_p5 = por %p1425_p1, %p1424_p13 }
 0x4f7   : > { %p1427_p9 = pnand %p1426_p5, %p1420_p8 }
 0x4f9   : > { %1430 = shalt.err (!%p1427_p9)
}
 0x4fa   : > { %s1493_s12 = smov 256  }
 0x4fb   : > { %1261 = dma.vmem_to_hbm [thread:$0]  (%p1980_p6), %s1898_s29, 1024, %s1896_s30, %s1904_s17, %s1493_s12, %s1493_s12, %s1488_s21  }
 0x4fc PF: > { %p1283_p10 = scmp.ge.s32.totalorder %s1477_s16, 2  ;;  %s1121_s18 = sand.u32 1, %s1465_s13  }
 0x4fd   : > { %p1981_p2 = scmp.ne.s32.totalorder %s1968_s24, 0  ;;  %s1122_s9 = scalar_lea.sflag [#allocation4], %s1121_s18 }
 0x4ff   : > { %p1274_p3 = pnand %p1283_p10, %p1981_p2 }
 0x501   : > { %1460 = dma.done.wait (!%p1274_p3), %s1122_s9, 1024  }
 0x502   : > { %1462 = vsyncadd (!%p1274_p3), %s1122_s9, 4294966272  ;;  %s1982_s16 = sld [smem:[#allocation15_spill]]  ;;  %s1983_s26 = sld [smem:[#allocation14_spill]] }
 0x503   : > { %s1984_s15 = sld [smem:[#allocation16_spill]]  ;;  %s1985_s13 = smov %s1469_s14 }
 0x508   : > { %p23_p4 = scmp.ge.s32.totalorder %s1982_s16, 4   ;;  %s1986_s14 = smov %s1983_s26 }
 0x50a   :  { %25 = sbr.rel (!%p23_p4) target bundleno = 8 (0x8), region = 109 }
 0x511   :  { %1127 = vsyncpa [#allocation3], 1 }
 0x512   :  { %1129 = vsyncpa [#allocation3 + $0x1], 1 }
 0x513   :  { %1130 = vsyncpa [#allocation7], 1 }
 0x514   :  { %1131 = vsyncpa [#allocation4], 1 }
 0x515   :  { %1133 = vsyncpa [#allocation4 + $0x1], 1 }
 0x516   :  { %1134 = vsyncpa [#allocation5], 1 }
 0x517   :  { %1136 = vsyncpa [#allocation5 + $0x1], 1 }

</bundles_post_ra>
